<compile_context>
chip_gen: v7x
topology: tpu7x:2x2x1
jax: 0.10.0
libtpu: 0.0.40
codegen_flags: <defaults>
</compile_context>

<pallas_src>
import jax
import jax.numpy as jnp
from jax.experimental import pallas as pl
from jax.experimental.pallas import tpu as pltpu


def identity_copy_kernel(x_hbm, o_hbm, copy_sem):
    # One contiguous HBM -> HBM DMA covering the whole array.  No VMEM bounce,
    # no tiling, no compute.
    cp = pltpu.make_async_copy(x_hbm, o_hbm, copy_sem)
    cp.start()
    cp.wait()


def pallas_identity(x):
    """Identity forward: returns a tensor equal to x via a single HBM->HBM DMA."""
    if x.size == 0:
        # Nothing to copy; avoid issuing a zero-length DMA.
        return x
    return pl.pallas_call(
        identity_copy_kernel,
        out_shape=jax.ShapeDtypeStruct(x.shape, x.dtype),
        in_specs=[pl.BlockSpec(memory_space=pl.ANY)],   # leave input in HBM, no auto-DMA
        out_specs=pl.BlockSpec(memory_space=pl.ANY),    # output stays in HBM too
        scratch_shapes=[pltpu.SemaphoreType.DMA],       # completion semaphore for the copy
    )(x)


if __name__ == "__main__":
    # Small NCHW example consistent with the module's forward: any tensor works.
    key = jax.random.PRNGKey(0)
    x = jax.random.normal(key, (2, 4, 16, 16), jnp.float32)

    y = pallas_identity(x)
    y = jax.block_until_ready(y)

    assert y.shape == x.shape, (y.shape, x.shape)
    assert y.dtype == x.dtype, (y.dtype, x.dtype)
    # Input is finite (no NaNs), so exact equality is the right check here.
    assert jnp.array_equal(y, x), float(jnp.max(jnp.abs(y - x)))

    print("KERNEL_OK")
</pallas_src>

<mosaic_0001>
module attributes {stable_mosaic.version = 11 : i64} {
  func.func @identity_copy_kernel(%arg0: memref<2x4x16x16xf32, #tpu.memory_space<any>>, %arg1: memref<2x4x16x16xf32, #tpu.memory_space<any>>, %arg2: memref<!tpu.dma_semaphore, #tpu.memory_space<semaphore_mem>>) attributes {dimension_semantics = [], scalar_prefetch = 0 : i64, scratch_operands = 1 : i64, tpu.core_type = #tpu.core_type<tc>} {
    tpu.enqueue_dma source(%arg0 : memref<2x4x16x16xf32, #tpu.memory_space<any>>) target(%arg1 : memref<2x4x16x16xf32, #tpu.memory_space<any>>) target_semaphore(%arg2 : memref<!tpu.dma_semaphore, #tpu.memory_space<semaphore_mem>>)
    tpu.wait_dma2 semaphore(%arg2 : memref<!tpu.dma_semaphore, #tpu.memory_space<semaphore_mem>>) src(%arg0 : memref<2x4x16x16xf32, #tpu.memory_space<any>>) dst(%arg1 : memref<2x4x16x16xf32, #tpu.memory_space<any>>)
    return
  }
}

</mosaic_0001>

<bundles_post_ra>
// kernel: tpu_custom_call.1
= control target key start
LH: loop header
LB: loop body
LE: loop exit
PB: predicated region body
PF: predicated region fallthrough
CT: control target
= control target key end

     0   :  { %s36_s6 = smov [#allocation2]   ;;  %s37_s7 = smov [#allocation3]   ;;  %s55_s0 = inlined_call_operand.hbm [shape: f32[2,4,16,16], index: 0, kind: input, shape index: {}]   ;;  %s56_s1 = inlined_call_operand.hbm [shape: f32[2,4,16,16], index: 1, kind: output, shape index: {}]  }
   0x1   :  { %s38_s8 = smov 0  }
   0x2   :  { %18 = dma.general %s55_s0, 2048, %s56_s1, %s36_s6, %s37_s7, [#allocation4], %s38_s8, 0  }
   0x3   :  { %34 = dma.done.wait [#allocation2], 2048 }
   0x4   :  { %35 = vsyncadd [#allocation2], 4294965248 }
   0x5   :  { %24 = vsyncmov [#allocation2] }
   0x8   :  { %s25_s13 = vpop.sfrf %24 }
   0x9   :  { %p30_p0 = scmp.ne.s32.totalorder %s25_s13, 0 }
   0xb   :  { %29 = shalt.err (%p30_p0)  }

</bundles_post_ra>
